<compile_context>
chip_gen: v5e
topology: v5e:2x2
jax: 0.10.0
libtpu: 0.0.40
codegen_flags: <defaults>
</compile_context>

<pallas_src>
import functools
import math

import jax
import jax.numpy as jnp
from jax.experimental import pallas as pl
from jax.experimental.pallas import tpu as pltpu


# --------------------------------------------------------------------------- #
# Kernels
# --------------------------------------------------------------------------- #
def _pe_recompute_kernel(x_ref, o_ref, *, d, k):
    """out = x + PE, PE regenerated in-kernel.

    Block layout is (bs, ts, k*d): each packed row holds k consecutive
    sequence positions (k == 1 when no lane packing is applied).
    PE depends only on (position, hidden) -> shared across the batch dim.
    """
    _, ts, dp = x_ref.shape

    # Per-lane constants on a (1, dp) row (computed once per tile).
    jp = jax.lax.broadcasted_iota(jnp.int32, (1, dp), 1)        # packed lane index
    sub = (jp // d).astype(jnp.float32)                         # sub-position in packed row
    j = jp % d                                                  # original hidden index
    pair = (j // 2).astype(jnp.float32)                         # floor(j/2)
    # inv_freq[j] = 10000^(-2*floor(j/2)/d)
    inv_freq = jnp.exp(-(2.0 * pair / float(d)) * jnp.log(jnp.float32(10000.0)))
    # odd lanes get a +pi/2 phase so a single sin() yields cos() there
    phase = (j % 2).astype(jnp.float32) * jnp.float32(math.pi / 2.0)
    lane_const = sub * inv_freq + phase                         # (1, dp)
    row_freq = inv_freq * jnp.float32(k)                        # (1, dp)

    # Packed-row positions for this tile (seq grid axis = 1).
    offset = (pl.program_id(1) * ts).astype(jnp.float32)
    row = jax.lax.broadcasted_iota(jnp.float32, (ts, 1), 0) + offset   # (ts, 1)

    # pos = row*k + sub ; single transcendental per element.
    pe = jnp.sin(row * row_freq + lane_const)                   # (ts, dp)

    # dropout p = 0 -> identity after the add
    o_ref[...] = x_ref[...] + pe[None].astype(x_ref.dtype)


def _pe_table_kernel(x_ref, p_ref, o_ref):
    """out = x + P, with P streamed as a precomputed (ts, dp) tile (B <= 2 path)."""
    o_ref[...] = x_ref[...] + p_ref[...]


# --------------------------------------------------------------------------- #
# Host-side helpers
# --------------------------------------------------------------------------- #
def _build_pe_table(S, D):
    """P[:S] computed exactly like the PyTorch module (even D assumed)."""
    pos = jnp.arange(S, dtype=jnp.float32).reshape(-1, 1)
    div = jnp.power(10000.0, jnp.arange(0, D, 2, dtype=jnp.float32) / jnp.float32(D))
    ang = pos / div
    pe = jnp.zeros((S, D), jnp.float32)
    pe = pe.at[:, 0::2].set(jnp.sin(ang))
    pe = pe.at[:, 1::2].set(jnp.cos(ang))
    return pe


def _vmem_limit_bytes():
    """Scoped VMEM limit: ~3/4 of physical capacity, conservative fallback."""
    try:
        info = pltpu.get_tpu_info()
        cap = int(getattr(info, "vmem_capacity_bytes", 0)) or (64 << 20)
    except Exception:  # noqa: BLE001 - older jax / no device context
        cap = 64 << 20
    return max(16 << 20, (cap * 3) // 4)


def _round_dn(v, m):
    return (v // m) * m


def _round_up(v, m):
    return ((v + m - 1) // m) * m


# --------------------------------------------------------------------------- #
# Public wrapper
# --------------------------------------------------------------------------- #
def positional_encoding(x, max_len=1000, seq_tile=None, donate=False):
    """x: (B, S, D). Returns x + P[:, :S, :] (dropout p=0 => no-op).

    seq_tile (optional) is given in original sequence positions.
    donate=True adds input_output_aliases={0: 0} (caller may donate x).
    """
    B, S, D = x.shape
    assert S <= max_len, "sequence length exceeds max_len of the reference module"
    dtype = x.dtype
    itemsize = dtype.itemsize

    # ---- lane-dense packing: fold k consecutive positions into the last dim ----
    k = 1
    if D < 128 and 128 % D == 0 and S % (128 // D) == 0:
        k = 128 // D
    Sp, DP = S // k, k * D
    x_packed = x.reshape(B, Sp, DP) if k > 1 else x

    # ---- dtype-aware sublane granularity ----
    sub_mult = {4: 8, 2: 16, 1: 32}.get(itemsize, 8)

    # ---- VMEM limit / per-buffer budget ----
    vmem_limit = _vmem_limit_bytes()
    budget = vmem_limit // 6          # in + out (+ table) double-buffered, headroom

    row_bytes = DP * itemsize

    # ---- batch tile: shrink if even sub_mult packed rows would blow the budget ----
    bs = B
    if bs * sub_mult * row_bytes > budget:
        bs = max(1, budget // (sub_mult * row_bytes))

    # ---- seq tile (in packed rows) ----
    max_rows = max(sub_mult, _round_dn(budget // max(bs * row_bytes, 1), sub_mult))
    if seq_tile is not None:
        ts = min(Sp, _round_up(max(1, seq_tile // k), sub_mult))
    else:
        ts = Sp if Sp <= max_rows else max_rows
        # Keep >= 2 grid steps so both v7x TensorCores get work.
        if bs >= B and ts >= Sp and Sp >= 2 * sub_mult:
            ts = _round_up(pl.cdiv(Sp, 2), sub_mult)

    grid = (pl.cdiv(B, bs), pl.cdiv(Sp, ts))

    compiler_params = pltpu.CompilerParams(
        dimension_semantics=("parallel", "parallel"),
        vmem_limit_bytes=int(vmem_limit),
    )
    io_aliases = {0: 0} if donate else {}

    out_shape = jax.ShapeDtypeStruct((B, Sp, DP), dtype)
    x_spec = pl.BlockSpec((bs, ts, DP), lambda b, s: (b, s, 0))
    o_spec = pl.BlockSpec((bs, ts, DP), lambda b, s: (b, s, 0))

    if B <= 2:
        # Small batch: stream a precomputed P tile instead of recomputing sin
        # per tile; the extra read is only 1/B of the X traffic.
        p = _build_pe_table(S, D).reshape(Sp, DP).astype(dtype)
        out = pl.pallas_call(
            _pe_table_kernel,
            out_shape=out_shape,
            grid_spec=pltpu.PrefetchScalarGridSpec(
                num_scalar_prefetch=0,
                grid=grid,
                in_specs=[x_spec, pl.BlockSpec((ts, DP), lambda b, s: (s, 0))],
                out_specs=o_spec,
            ),
            compiler_params=compiler_params,
            input_output_aliases=io_aliases,
        )(x_packed, p)
    else:
        kernel = functools.partial(_pe_recompute_kernel, d=D, k=k)
        out = pl.pallas_call(
            kernel,
            out_shape=out_shape,
            grid_spec=pltpu.PrefetchScalarGridSpec(
                num_scalar_prefetch=0,
                grid=grid,
                in_specs=[x_spec],
                out_specs=o_spec,
            ),
            compiler_params=compiler_params,
            input_output_aliases=io_aliases,
        )(x_packed)

    return out.reshape(B, S, D) if k > 1 else out


def positional_encoding_ref(x, max_len=1000):
    """Pure-JAX reference mirroring the PyTorch module exactly (even num_hiddens)."""
    B, S, D = x.shape
    P = _build_pe_table(max_len, D)[None]
    return x + P[:, :S, :]


# --------------------------------------------------------------------------- #
# Self-test
# --------------------------------------------------------------------------- #
if __name__ == "__main__":
    key = jax.random.PRNGKey(0)

    # Module-usage shape: (batch=2, num_steps=8, encoding_dim=32) -> table path,
    # lane-packed to last dim 128.
    B, S, D = 2, 8, 32
    x = jax.random.normal(key, (B, S, D), dtype=jnp.float32)
    out = jax.block_until_ready(positional_encoding(x))
    ref = positional_encoding_ref(x)
    assert out.shape == ref.shape and out.dtype == ref.dtype
    assert jnp.allclose(out, ref, atol=1e-5, rtol=1e-5), "mismatch vs reference"

    # Original usage pattern: zeros input -> output is P itself.
    z = jnp.zeros((1, S, D), dtype=jnp.float32)
    outz = jax.block_until_ready(positional_encoding(z))
    assert jnp.allclose(outz, positional_encoding_ref(z), atol=1e-5, rtol=1e-5)

    # Recompute path (B > 2) + multi-tile seq grid (exercises the pos offset).
    x2 = jax.random.normal(jax.random.PRNGKey(1), (4, 64, 32), dtype=jnp.float32)
    out2 = jax.block_until_ready(positional_encoding(x2, seq_tile=32))
    assert jnp.allclose(out2, positional_encoding_ref(x2), atol=1e-5, rtol=1e-5)

    # D >= 128 (no lane packing), auto-split into >= 2 grid steps (megacore).
    x3 = jax.random.normal(jax.random.PRNGKey(2), (2, 64, 128), dtype=jnp.float32)
    out3 = jax.block_until_ready(positional_encoding(x3))
    assert jnp.allclose(out3, positional_encoding_ref(x3), atol=1e-5, rtol=1e-5)

    # Non-packable D (128 % D != 0): falls back to full-D last dim, recompute path.
    x4 = jax.random.normal(jax.random.PRNGKey(3), (4, 16, 48), dtype=jnp.float32)
    out4 = jax.block_until_ready(positional_encoding(x4))
    assert jnp.allclose(out4, positional_encoding_ref(x4), atol=1e-5, rtol=1e-5)

    print("KERNEL_OK")
</pallas_src>

<mosaic_0001>
module attributes {stable_mosaic.version = 11 : i64} {
  func.func @_pe_table_kernel(%arg0: i32, %arg1: i32, %arg2: memref<2x2x128xf32, #tpu.memory_space<vmem>>, %arg3: memref<2x128xf32, #tpu.memory_space<vmem>>, %arg4: memref<2x2x128xf32, #tpu.memory_space<vmem>>) attributes {dimension_semantics = [#tpu.dimension_semantics<parallel>, #tpu.dimension_semantics<parallel>], iteration_bounds = array<i64: 1, 1>, scalar_prefetch = 0 : i64, scratch_operands = 0 : i64, tpu.core_type = #tpu.core_type<tc>, window_params = [{transform_indices = @transform_0, window_bounds = array<i64: 2, 2, 128>}, {transform_indices = @transform_1, window_bounds = array<i64: 2, 128>}, {transform_indices = @transform_2, window_bounds = array<i64: 2, 2, 128>}]} {
    %c0 = arith.constant 0 : index
    %c0_0 = arith.constant 0 : index
    %c0_1 = arith.constant 0 : index
    %0 = vector.load %arg2[%c0, %c0_0, %c0_1] : memref<2x2x128xf32, #tpu.memory_space<vmem>>, vector<2x2x128xf32>
    %c0_2 = arith.constant 0 : index
    %c0_3 = arith.constant 0 : index
    %1 = vector.load %arg3[%c0_2, %c0_3] : memref<2x128xf32, #tpu.memory_space<vmem>>, vector<2x128xf32>
    %2 = vector.shape_cast %1 : vector<2x128xf32> to vector<1x2x128xf32>
    %3 = vector.broadcast %2 : vector<1x2x128xf32> to vector<2x2x128xf32>
    %4 = arith.addf %0, %3 : vector<2x2x128xf32>
    %c0_4 = arith.constant 0 : index
    %c0_5 = arith.constant 0 : index
    %c0_6 = arith.constant 0 : index
    %5 = vector.load %arg4[%c0_4, %c0_5, %c0_6] : memref<2x2x128xf32, #tpu.memory_space<vmem>>, vector<2x2x128xf32>
    tpu.vector_store %arg4[%c0_4, %c0_5, %c0_6], %4 {strides = array<i32>} : memref<2x2x128xf32, #tpu.memory_space<vmem>>, vector<2x2x128xf32>,
    return
  }
  func.func @transform_0(%arg0: i32, %arg1: i32) -> (i32, i32, i32) {
    %c0_i32 = arith.constant 0 : i32
    %c0_i32_0 = arith.constant 0 : i32
    return %arg0, %arg1, %c0_i32 : i32, i32, i32
  }
  func.func @transform_1(%arg0: i32, %arg1: i32) -> (i32, i32) {
    %c0_i32 = arith.constant 0 : i32
    %c0_i32_0 = arith.constant 0 : i32
    return %arg1, %c0_i32 : i32, i32
  }
  func.func @transform_2(%arg0: i32, %arg1: i32) -> (i32, i32, i32) {
    %c0_i32 = arith.constant 0 : i32
    %c0_i32_0 = arith.constant 0 : i32
    return %arg0, %arg1, %c0_i32 : i32, i32, i32
  }
}

</mosaic_0001>

<bundles_post_ra>
// kernel: tpu_custom_call.1
= control target key start
LH: loop header
LB: loop body
LE: loop exit
PB: predicated region body
PF: predicated region fallthrough
CT: control target
= control target key end

     0   :  { %7 = vsyncpa [#allocation3], 0  ;;  %s181_s0 = inlined_call_operand.hbm [shape: f32[2,2,128], index: 0, kind: input, shape index: {}]   ;;  %s182_s1 = inlined_call_operand.hbm [shape: f32[2,128], index: 1, kind: input, shape index: {}]   ;;  %s183_s2 = inlined_call_operand.hbm [shape: f32[2,2,128], index: 2, kind: output, shape index: {}]  }
   0x1   :  { %8 = vsyncpa [#allocation6], 0 }
   0x2   :  { %9 = vsyncpa [#allocation4], 0  ;;  %s14_s11 = sshll.u32 %s181_s0, 4  ;;  %s152_s12 = smov [#allocation2]   ;;  %s15_s11 = int_to_ptr.hbm [resolvable:$true] %s14_s11 }
   0x3   :  { %s16_s13 = sshll.u32 %s152_s12, 4  ;;  %s28_s16 = sshll.u32 %s182_s1, 4  ;;  %s17_s13 = int_to_ptr.vmem [resolvable:$true] %s16_s13  ;;  %s29_s16 = int_to_ptr.hbm [resolvable:$true] %s28_s16 }
   0x4   :  { %s153_s17 = smov 32   ;;  %s154_s18 = smov 2  }
   0x5   :  { %22 = dma.hbm_to_vmem [thread:$0]  %s15_s11, 64, %s17_s13, [#allocation3], %s153_s17, %s153_s17, %s154_s18  }
   0x6   :  { %s155_s19 = smov [#allocation5]  }
   0x7   :  { %s30_s20 = sshll.u32 %s155_s19, 4  ;;  %s31_s20 = int_to_ptr.vmem [resolvable:$true] %s30_s20 }
   0x8   :  { %33 = dma.hbm_to_vmem [thread:$0]  %s29_s16, 32, %s31_s20, [#allocation6]  }
   0x9   :  { %146 = dma.done.wait [#allocation3], 64  }
   0xa   :  { %147 = vsyncadd [#allocation3], 4294967232 }
   0xb   :  { %148 = dma.done.wait [#allocation6], 32  }
   0xc   :  { %149 = vsyncadd [#allocation6], 4294967264  ;;  %s156_s0 = smov [#allocation7]   ;;  %s55_s24 = sshll.u32 %s183_s2, 4  ;;  %v42_v0 = vld [vmem:[#allocation2] sm:$0x3]  ;;  %s56_s24 = int_to_ptr.hbm [resolvable:$true] %s55_s24 }
   0xd   :  { %s53_s21 = sshll.u32 %s156_s0, 4  ;;  %v44_v1 = vld [vmem:[#allocation5] sm:$0x3]  ;;  %v43_v2 = vld [vmem:[#allocation2 + $0x2] sm:$0x3]  ;;  %s54_s21 = int_to_ptr.vmem [resolvable:$true] %s53_s21 }
   0xe   :  { %v45_v3 = vadd.f32 %v44_v1, %v42_v0  ;;  %v46_v4 = vadd.f32 %v44_v1, %v43_v2 }
  0x10   :  { %47 = vst [vmem:[#allocation7] sm:$0x3] %v45_v3 }
  0x11   :  { %48 = vst [vmem:[#allocation7 + $0x2] sm:$0x3] %v46_v4 }
  0x12   :  { %61 = dma.vmem_to_hbm [thread:$0]  %s54_s21, 64, %s56_s24, [#allocation4], %s153_s17, %s153_s17, %s154_s18  }
  0x13   :  { %150 = dma.done.wait [#allocation4], 64  }
  0x14   :  { %151 = vsyncadd [#allocation4], 4294967232 }
  0x15   :  { %66 = vsyncpa [#allocation3], 1 }
  0x16   :  { %67 = vsyncpa [#allocation6], 1 }
  0x17   :  { %68 = vsyncpa [#allocation4], 1 }

</bundles_post_ra>
